<compile_context>
chip_gen: v6e
topology: v6e:2x2x1
jax: 0.10.0
libtpu: 0.0.40
codegen_flags: <defaults>
</compile_context>

<pallas_src>
import functools

import jax
import jax.numpy as jnp
from jax.experimental import pallas as pl
from jax.experimental.pallas import tpu as pltpu


def _round_up(n: int, m: int) -> int:
    return ((n + m - 1) // m) * m


def _cdiv(a: int, b: int) -> int:
    return -(-a // b)


def _default_vmem_limit() -> int:
    """~3/4 of physical VMEM; conservative 48 MiB fallback (v7x-safe)."""
    try:
        cap = int(pltpu.get_tpu_info().vmem_capacity_bytes)
    except Exception:
        cap = 64 * 1024 * 1024
    return max(32 * 1024 * 1024, min((cap * 3) // 4, 100 * 1024 * 1024))


# ----------------------------------------------------------------------------
# Kernel: one (tm, Dp) row slab per i-step; Dff streamed in tf-wide chunks
# along the k (reduction) axis with an f32 VMEM accumulator.
# ----------------------------------------------------------------------------
def _ffn_kernel(x_ref, w1_ref, b1_ref, w2_ref, b2_ref, o_ref, acc_ref, *,
                matmul_dtype, silu_dtype):
    k = pl.program_id(1)

    @pl.when(k == 0)
    def _init():
        acc_ref[...] = jnp.zeros_like(acc_ref)

    # linear1 chunk: (tm, Dp) @ (Dp, tf) -> (tm, tf), f32 accumulate + bias.
    h = jnp.dot(x_ref[...], w1_ref[...],
                preferred_element_type=jnp.float32) + b1_ref[...]

    # SiLU, single-tanh logistic (1 EUP op/elem): sigmoid(h) = 0.5*tanh(0.5h)+0.5.
    # silu_dtype=bf16 on v6e/v7x halves EUP work; keep f32 on v5e.
    hs = h.astype(silu_dtype)
    a = hs * (jnp.tanh(hs * 0.5) * 0.5 + 0.5)

    # dropout (eval) = identity; linear2 chunk: (tm, tf) @ (tf, Dp) accumulate.
    acc_ref[...] += jnp.dot(a.astype(matmul_dtype), w2_ref[...],
                            preferred_element_type=jnp.float32)

    @pl.when(k == pl.num_programs(1) - 1)
    def _finalize():
        o_ref[...] = (acc_ref[...] + b2_ref[...]).astype(o_ref.dtype)


# ----------------------------------------------------------------------------
# One-time parameter preparation (hoist out of the per-call path).
# ----------------------------------------------------------------------------
def prepare_ffn_params(w1, b1, w2, b2, *, matmul_dtype=jnp.bfloat16):
    """Pad to 128-multiples, pre-transpose, and cast the weights ONCE.

    w1 : (Dff, D), b1: (Dff,)   torch linear1 (out_features, in_features)
    w2 : (D, Dff), b2: (D,)     torch linear2
    Returns (w1_p, b1_p, w2_p, b2_p) with w1_p:(Dp,Fp), w2_p:(Fp,Dp).
    """
    Dff, D = w1.shape
    Dp = _round_up(D, 128)
    Fp = _round_up(Dff, 128)
    w1_p = jnp.zeros((Dp, Fp), matmul_dtype).at[:D, :Dff].set(
        w1.T.astype(matmul_dtype))
    w2_p = jnp.zeros((Fp, Dp), matmul_dtype).at[:Dff, :D].set(
        w2.T.astype(matmul_dtype))
    b1_p = jnp.zeros((1, Fp), jnp.float32).at[0, :Dff].set(b1.astype(jnp.float32))
    b2_p = jnp.zeros((1, Dp), jnp.float32).at[0, :D].set(b2.astype(jnp.float32))
    return (w1_p, b1_p, w2_p, b2_p)


# ----------------------------------------------------------------------------
# Hot-path wrapper: flatten batch/time, pad only if needed, tile rows & Dff.
# ----------------------------------------------------------------------------
def custom_feed_forward_prepared(x, params, *,
                                 tile_m: int = 512,
                                 tile_f: int = 512,
                                 silu_dtype=jnp.float32,
                                 out_dtype=None,
                                 vmem_limit_bytes=None):
    w1_p, b1_p, w2_p, b2_p = params
    matmul_dtype = w1_p.dtype
    out_dtype = x.dtype if out_dtype is None else out_dtype

    orig_shape = x.shape
    D = orig_shape[-1]
    Dp, Fp = w1_p.shape
    x2 = x.reshape(-1, D)
    M = x2.shape[0]

    # Row tile: multiple of 16 (bf16 min sublane tile; also covers f32's 8).
    # Shrink so the row grid has >=4 steps when M allows (>=2 per TC on v7x).
    tm = max(16, min(_round_up(tile_m, 16), _round_up(M, 16)))
    while tm > 128 and _cdiv(M, tm) < 4:
        tm = _round_up(tm // 2, 16)
    Mp = _round_up(M, tm)
    n_i = Mp // tm

    # Dff chunk: largest multiple of 128 dividing Fp, capped at tile_f.
    tf = min(_round_up(tile_f, 128), Fp)
    while Fp % tf:
        tf -= 128
    n_k = Fp // tf

    # Activations: pad/cast once, in matmul_dtype; skip the pad copy entirely
    # when already aligned.
    if M == Mp and D == Dp:
        x_p = x2.astype(matmul_dtype)
    else:
        x_p = jnp.zeros((Mp, Dp), matmul_dtype).at[:M, :D].set(
            x2.astype(matmul_dtype))

    isz = jnp.dtype(matmul_dtype).itemsize
    osz = jnp.dtype(out_dtype).itemsize
    cost = pl.CostEstimate(
        flops=4 * Mp * Dp * Fp,              # two matmuls, 2 flops/MAC
        transcendentals=Mp * Fp,             # one tanh per hidden element
        bytes_accessed=(Mp * Dp * isz + Mp * Dp * osz
                        + n_i * 2 * Dp * Fp * isz      # streamed weight chunks
                        + 4 * Fp + 4 * Dp),            # biases
    )

    if vmem_limit_bytes is None:
        vmem_limit_bytes = _default_vmem_limit()

    out = pl.pallas_call(
        functools.partial(_ffn_kernel,
                          matmul_dtype=matmul_dtype, silu_dtype=silu_dtype),
        out_shape=jax.ShapeDtypeStruct((Mp, Dp), out_dtype),
        grid=(n_i, n_k),
        in_specs=[
            pl.BlockSpec((tm, Dp), lambda i, k: (i, 0)),   # x: resident over k
            pl.BlockSpec((Dp, tf), lambda i, k: (0, k)),   # W1 chunk (streams)
            pl.BlockSpec((1, tf), lambda i, k: (0, k)),    # b1 chunk
            pl.BlockSpec((tf, Dp), lambda i, k: (k, 0)),   # W2 chunk (streams)
            pl.BlockSpec((1, Dp), lambda i, k: (0, 0)),    # b2 (grid-invariant)
        ],
        out_specs=pl.BlockSpec((tm, Dp), lambda i, k: (i, 0)),
        scratch_shapes=[pltpu.VMEM((tm, Dp), jnp.float32)],
        compiler_params=pltpu.CompilerParams(
            dimension_semantics=("parallel", "arbitrary"),
            vmem_limit_bytes=int(vmem_limit_bytes),
        ),
        cost_estimate=cost,
    )(x_p, w1_p, b1_p, w2_p, b2_p)

    if (Mp, Dp) != (M, D):
        out = out[:M, :D]
    return out.reshape(orig_shape[:-1] + (D,))


def custom_feed_forward(x, w1, b1, w2, b2, *,
                        matmul_dtype=jnp.bfloat16, **kwargs):
    """Convenience one-shot wrapper (prepares params every call).

    For repeated inference, call prepare_ffn_params() once and reuse it with
    custom_feed_forward_prepared().
    """
    params = prepare_ffn_params(w1, b1, w2, b2, matmul_dtype=matmul_dtype)
    return custom_feed_forward_prepared(x, params, **kwargs)


# ----------------------------------------------------------------------------
# Reference (pure JAX, fp32) for validation.
# ----------------------------------------------------------------------------
def _ref_ffn(x, w1, b1, w2, b2):
    h = x @ w1.T + b1
    h = h * jax.nn.sigmoid(h)
    return h @ w2.T + b2


if __name__ == "__main__":
    key = jax.random.PRNGKey(0)
    ks = jax.random.split(key, 10)

    # --- small shapes consistent with the module: (B, T, D), D->Dff->D -------
    B, T, D, Dff = 2, 8, 32, 64
    x = jax.random.normal(ks[0], (B, T, D), jnp.float32)
    w1 = jax.random.normal(ks[1], (Dff, D), jnp.float32) * 0.1
    b1 = jax.random.normal(ks[2], (Dff,), jnp.float32) * 0.1
    w2 = jax.random.normal(ks[3], (D, Dff), jnp.float32) * 0.1
    b2 = jax.random.normal(ks[4], (D,), jnp.float32) * 0.1

    ref = _ref_ffn(x, w1, b1, w2, b2)

    # Weight prep hoisted out of the jitted hot path (done once, reused).
    params_bf16 = prepare_ffn_params(w1, b1, w2, b2, matmul_dtype=jnp.bfloat16)
    params_f32 = prepare_ffn_params(w1, b1, w2, b2, matmul_dtype=jnp.float32)

    ffn_prepared = jax.jit(custom_feed_forward_prepared)

    out_bf16 = jax.block_until_ready(ffn_prepared(x, params_bf16))
    assert out_bf16.shape == (B, T, D)
    assert bool(jnp.all(jnp.isfinite(out_bf16)))
    assert bool(jnp.allclose(out_bf16, ref, rtol=3e-2, atol=3e-2)), "bf16 path mismatch"

    out_f32 = jax.block_until_ready(ffn_prepared(x, params_f32))
    assert bool(jnp.allclose(out_f32, ref, rtol=1e-4, atol=1e-4)), "f32 path mismatch"

    # --- larger, unaligned shapes: exercises row tiling + D/Dff/M padding and
    # the Dff-chunk reduction path via the one-shot convenience wrapper. ------
    B2, T2, D2, F2 = 2, 200, 96, 384
    x_l = jax.random.normal(ks[5], (B2, T2, D2), jnp.float32)
    w1_l = jax.random.normal(ks[6], (F2, D2), jnp.float32) * 0.1
    b1_l = jax.random.normal(ks[7], (F2,), jnp.float32) * 0.1
    w2_l = jax.random.normal(ks[8], (D2, F2), jnp.float32) * 0.1
    b2_l = jax.random.normal(ks[9], (D2,), jnp.float32) * 0.1

    ref_l = _ref_ffn(x_l, w1_l, b1_l, w2_l, b2_l)
    ffn_oneshot = jax.jit(functools.partial(custom_feed_forward,
                                            matmul_dtype=jnp.bfloat16,
                                            tile_f=128))   # force multi-chunk k axis
    out_l = jax.block_until_ready(ffn_oneshot(x_l, w1_l, b1_l, w2_l, b2_l))
    assert out_l.shape == (B2, T2, D2)
    assert bool(jnp.all(jnp.isfinite(out_l)))
    assert bool(jnp.allclose(out_l, ref_l, rtol=5e-2, atol=5e-2)), "tiled path mismatch"

    print("KERNEL_OK")
</pallas_src>

<mosaic_0001>
module attributes {stable_mosaic.version = 11 : i64} {
  func.func @_ffn_kernel(%arg0: i32, %arg1: i32, %arg2: memref<16x128xbf16, #tpu.memory_space<vmem>>, %arg3: memref<128x128xbf16, #tpu.memory_space<vmem>>, %arg4: memref<1x128xf32, #tpu.memory_space<vmem>>, %arg5: memref<128x128xbf16, #tpu.memory_space<vmem>>, %arg6: memref<1x128xf32, #tpu.memory_space<vmem>>, %arg7: memref<16x128xf32, #tpu.memory_space<vmem>>, %arg8: memref<16x128xf32, #tpu.memory_space<vmem>>) attributes {dimension_semantics = [#tpu.dimension_semantics<parallel>, #tpu.dimension_semantics<arbitrary>], iteration_bounds = array<i64: 1, 1>, scalar_prefetch = 0 : i64, scratch_operands = 1 : i64, tpu.core_type = #tpu.core_type<tc>, window_params = [{transform_indices = @transform_0, window_bounds = array<i64: 16, 128>}, {transform_indices = @transform_1, window_bounds = array<i64: 128, 128>}, {transform_indices = @transform_2, window_bounds = array<i64: 1, 128>}, {transform_indices = @transform_3, window_bounds = array<i64: 128, 128>}, {pipeline_mode = #tpu.pipeline_mode<synchronous>, transform_indices = @transform_4, window_bounds = array<i64: 1, 128>}, {transform_indices = @transform_5, window_bounds = array<i64: 16, 128>}]} {
    %c0_i32 = arith.constant 0 : i32
    %0 = arith.cmpi eq, %arg1, %c0_i32 : i32
    %1 = arith.extui %0 : i1 to i32
    %c0_i32_0 = arith.constant 0 : i32
    %2 = arith.cmpi ne, %1, %c0_i32_0 : i32
    scf.if %2 {
      %cst_18 = arith.constant 0.000000e+00 : f32
      %26 = vector.broadcast %cst_18 : f32 to vector<16x128xf32>
      %c0_19 = arith.constant 0 : index
      %c0_20 = arith.constant 0 : index
      %27 = vector.load %arg8[%c0_19, %c0_20] : memref<16x128xf32, #tpu.memory_space<vmem>>, vector<16x128xf32>
      tpu.vector_store %arg8[%c0_19, %c0_20], %26 {strides = array<i32>} : memref<16x128xf32, #tpu.memory_space<vmem>>, vector<16x128xf32>,
    } else {
    }
    %c0 = arith.constant 0 : index
    %c0_1 = arith.constant 0 : index
    %3 = vector.load %arg2[%c0, %c0_1] : memref<16x128xbf16, #tpu.memory_space<vmem>>, vector<16x128xbf16>
    %c0_2 = arith.constant 0 : index
    %c0_3 = arith.constant 0 : index
    %4 = vector.load %arg3[%c0_2, %c0_3] : memref<128x128xbf16, #tpu.memory_space<vmem>>, vector<128x128xbf16>
    %cst = arith.constant dense<0.000000e+00> : vector<16x128xf32>
    %5 = tpu.matmul %3, %4, %cst {dimension_numbers = #tpu.dot_dimension_numbers<[1], [0], [0], [1], [0, 0, 1, 1], [], []>} : vector<16x128xbf16>, vector<128x128xbf16>, vector<16x128xf32> -> vector<16x128xf32>
    %c0_4 = arith.constant 0 : index
    %c0_5 = arith.constant 0 : index
    %6 = vector.load %arg4[%c0_4, %c0_5] : memref<1x128xf32, #tpu.memory_space<vmem>>, vector<1x128xf32>
    %7 = vector.broadcast %6 : vector<1x128xf32> to vector<16x128xf32>
    %8 = arith.addf %5, %7 : vector<16x128xf32>
    %cst_6 = arith.constant 5.000000e-01 : f32
    %9 = vector.broadcast %cst_6 : f32 to vector<16x128xf32>
    %10 = arith.mulf %8, %9 : vector<16x128xf32>
    %11 = math.tanh %10 : vector<16x128xf32>
    %cst_7 = arith.constant 5.000000e-01 : f32
    %12 = vector.broadcast %cst_7 : f32 to vector<16x128xf32>
    %13 = arith.mulf %11, %12 : vector<16x128xf32>
    %cst_8 = arith.constant 5.000000e-01 : f32
    %14 = vector.broadcast %cst_8 : f32 to vector<16x128xf32>
    %15 = arith.addf %13, %14 : vector<16x128xf32>
    %16 = arith.mulf %8, %15 : vector<16x128xf32>
    %c0_9 = arith.constant 0 : index
    %c0_10 = arith.constant 0 : index
    %17 = vector.load %arg8[%c0_9, %c0_10] : memref<16x128xf32, #tpu.memory_space<vmem>>, vector<16x128xf32>
    %18 = arith.truncf %16 : vector<16x128xf32> to vector<16x128xbf16>
    %c0_11 = arith.constant 0 : index
    %c0_12 = arith.constant 0 : index
    %19 = vector.load %arg5[%c0_11, %c0_12] : memref<128x128xbf16, #tpu.memory_space<vmem>>, vector<128x128xbf16>
    %cst_13 = arith.constant dense<0.000000e+00> : vector<16x128xf32>
    %20 = tpu.matmul %18, %19, %cst_13 {dimension_numbers = #tpu.dot_dimension_numbers<[1], [0], [0], [1], [0, 0, 1, 1], [], []>} : vector<16x128xbf16>, vector<128x128xbf16>, vector<16x128xf32> -> vector<16x128xf32>
    %21 = arith.addf %17, %20 : vector<16x128xf32>
    %c0_14 = arith.constant 0 : index
    %c0_15 = arith.constant 0 : index
    %22 = vector.load %arg8[%c0_14, %c0_15] : memref<16x128xf32, #tpu.memory_space<vmem>>, vector<16x128xf32>
    tpu.vector_store %arg8[%c0_14, %c0_15], %21 {strides = array<i32>} : memref<16x128xf32, #tpu.memory_space<vmem>>, vector<16x128xf32>,
    %c0_i32_16 = arith.constant 0 : i32
    %23 = arith.cmpi eq, %arg1, %c0_i32_16 : i32
    %24 = arith.extui %23 : i1 to i32
    %c0_i32_17 = arith.constant 0 : i32
    %25 = arith.cmpi ne, %24, %c0_i32_17 : i32
    scf.if %25 {
      %c0_18 = arith.constant 0 : index
      %c0_19 = arith.constant 0 : index
      %26 = vector.load %arg8[%c0_18, %c0_19] : memref<16x128xf32, #tpu.memory_space<vmem>>, vector<16x128xf32>
      %c0_20 = arith.constant 0 : index
      %c0_21 = arith.constant 0 : index
      %27 = vector.load %arg6[%c0_20, %c0_21] : memref<1x128xf32, #tpu.memory_space<vmem>>, vector<1x128xf32>
      %28 = vector.broadcast %27 : vector<1x128xf32> to vector<16x128xf32>
      %29 = arith.addf %26, %28 : vector<16x128xf32>
      %c0_22 = arith.constant 0 : index
      %c0_23 = arith.constant 0 : index
      %30 = vector.load %arg7[%c0_22, %c0_23] : memref<16x128xf32, #tpu.memory_space<vmem>>, vector<16x128xf32>
      tpu.vector_store %arg7[%c0_22, %c0_23], %29 {strides = array<i32>} : memref<16x128xf32, #tpu.memory_space<vmem>>, vector<16x128xf32>,
    } else {
    }
    return
  }
  func.func @transform_0(%arg0: i32, %arg1: i32) -> (i32, i32) {
    %c0_i32 = arith.constant 0 : i32
    %c0_i32_0 = arith.constant 0 : i32
    return %arg0, %c0_i32 : i32, i32
  }
  func.func @transform_1(%arg0: i32, %arg1: i32) -> (i32, i32) {
    %c0_i32 = arith.constant 0 : i32
    %c0_i32_0 = arith.constant 0 : i32
    return %c0_i32, %arg1 : i32, i32
  }
  func.func @transform_2(%arg0: i32, %arg1: i32) -> (i32, i32) {
    %c0_i32 = arith.constant 0 : i32
    %c0_i32_0 = arith.constant 0 : i32
    return %c0_i32, %arg1 : i32, i32
  }
  func.func @transform_3(%arg0: i32, %arg1: i32) -> (i32, i32) {
    %c0_i32 = arith.constant 0 : i32
    %c0_i32_0 = arith.constant 0 : i32
    return %arg1, %c0_i32 : i32, i32
  }
  func.func @transform_4(%arg0: i32, %arg1: i32) -> (i32, i32) {
    %c0_i32 = arith.constant 0 : i32
    %c0_i32_0 = arith.constant 0 : i32
    %c0_i32_1 = arith.constant 0 : i32
    return %c0_i32, %c0_i32_0 : i32, i32
  }
  func.func @transform_5(%arg0: i32, %arg1: i32) -> (i32, i32) {
    %c0_i32 = arith.constant 0 : i32
    %c0_i32_0 = arith.constant 0 : i32
    return %arg0, %c0_i32 : i32, i32
  }
}

</mosaic_0001>

<bundles_post_ra>
// kernel: custom_feed_forward_prepared.1
= control target key start
LH: loop header
LB: loop body
LE: loop exit
PB: predicated region body
PF: predicated region fallthrough
CT: control target
= control target key end

     0   :  { %10 = vsyncpa [#allocation4], 0  ;;  %s524_s0 = inlined_call_operand.vmem [shape: bf16[16,128], index: 0, kind: input, shape index: {}]   ;;  %s525_s1 = inlined_call_operand.hbm [shape: bf16[128,128], index: 1, kind: input, shape index: {}]   ;;  %s526_s2 = inlined_call_operand.vmem [shape: f32[1,128], index: 2, kind: input, shape index: {}]   ;;  %s527_s3 = inlined_call_operand.hbm [shape: bf16[128,128], index: 3, kind: input, shape index: {}]   ;;  %s528_s4 = inlined_call_operand.vmem [shape: f32[1,128], index: 4, kind: input, shape index: {}]   ;;  %s529_s5 = inlined_call_operand.vmem [shape: f32[16,128], index: 5, kind: output, shape index: {}]  }
   0x1   :  { %11 = vsyncpa [#allocation6], 0  ;;  %s467_s18 = smov [#allocation3]  }
   0x2   :  { %s19_s19 = sshll.u32 %s467_s18, 4  ;;  %s20_s19 = int_to_ptr.vmem [resolvable:$true] %s19_s19 }
   0x3   :  { %s431_s20 = scalar_lea.vmem %s20_s19, 1024  ;;  %p436_p1 = scmp.lt.s32.totalorder %s20_s19, %s20_s19 }
   0x4   :  { %p432_p0 = scmp.ne.s32.totalorder %s20_s19, %s431_s20  ;;  %p437_p2 = scmp.lt.s32.totalorder %s431_s20, %s431_s20 }
   0x6   :  { %p438_p3 = por %p437_p2, %p436_p1 }
   0x8   :  { %p439_p4 = pnand %p438_p3, %p432_p0 }
   0xa   :  { %442 = shalt.err (!%p439_p4)
}
   0xb   :  { %s468_s21 = smov 64   ;;  %s469_s22 = smov 4  }
   0xc   :  { %25 = dma.hbm_to_vmem [thread:$0]  %s525_s1, 1024, %s20_s19, [#allocation4], %s468_s21, %s468_s21, %s469_s22  }
   0xd   :  { %s470_s25 = smov [#allocation5]  }
   0xe   :  { %s33_s26 = sshll.u32 %s470_s25, 4  ;;  %s34_s26 = int_to_ptr.vmem [resolvable:$true] %s33_s26 }
   0xf   :  { %s451_s27 = scalar_lea.vmem %s34_s26, 1024  ;;  %p456_p6 = scmp.lt.s32.totalorder %s34_s26, %s34_s26 }
  0x10   :  { %p452_p5 = scmp.ne.s32.totalorder %s34_s26, %s451_s27  ;;  %p457_p7 = scmp.lt.s32.totalorder %s451_s27, %s451_s27 }
  0x12   :  { %p458_p8 = por %p457_p7, %p456_p6 }
  0x14   :  { %p459_p9 = pnand %p458_p8, %p452_p5 }
  0x16   :  { %462 = shalt.err (!%p459_p9)
}
  0x17   :  { %39 = dma.hbm_to_vmem [thread:$0]  %s527_s3, 1024, %s34_s26, [#allocation6], %s468_s21, %s468_s21, %s469_s22  }
  0x18   :  { %463 = dma.done.wait [#allocation4], 1024  }
  0x19   :  { %464 = vsyncadd [#allocation4], 4294966272 }
  0x1a   :  { %465 = dma.done.wait [#allocation6], 1024  }
  0x1b   :  { %466 = vsyncadd [#allocation6], 4294966272  ;;  %v471_v0 = vmov 0.0   ;;  %vm472_vm0 = vmmov 0   ;;  %v402_v1 = vld [vmem:[#allocation3 + $0x38] sm:$0xff]   ;;  %v403_v2 = vld [vmem:[#allocation3 + $0x30] sm:$0xff]  }
  0x1c   :  { %356 = vmatprep.subr.bf16.mxu0 %v471_v0  ;;  %372 = vmatprep.mubr.msk.bf16.mxu0 %vm472_vm0, %v471_v0  ;;  %v404_v3 = vld [vmem:[#allocation3 + $0x28] sm:$0xff]   ;;  %v405_v4 = vld [vmem:[#allocation3 + $0x20] sm:$0xff]   ;;  %v406_v5 = vld [vmem:[#allocation3 + $0x18] sm:$0xff]  }
  0x1d   :  { %376 = vmatprep.subr.bf16.mxu1 %v471_v0  ;;  %392 = vmatprep.mubr.msk.bf16.mxu1 %vm472_vm0, %v471_v0  ;;  %v407_v6 = vld [vmem:[#allocation3 + $0x10] sm:$0xff]   ;;  %v408_v7 = vld [vmem:[#allocation3 + $0x8] sm:$0xff]   ;;  %v409_v8 = vld [vmem:[#allocation3] sm:$0xff]  }
  0x1e   :  { %357 = vmatpush3.bf16.msra.mxu0 %v402_v1  ;;  %v410_v9 = vld [vmem:[%s524_s0] sm:$0xff]   ;;  %v411_v10 = vld [vmem:[#allocation5 + $0x38] sm:$0xff]   ;;  %v412_v11 = vld [vmem:[#allocation5 + $0x30] sm:$0xff]  }
  0x1f   :  { %358 = vmatprep.subr.bf16.mxu0 %v471_v0  ;;  %377 = vmatpush3.bf16.msra.mxu1 %v411_v10  ;;  %v413_v12 = vld [vmem:[#allocation5 + $0x28] sm:$0xff]   ;;  %v414_v13 = vld [vmem:[#allocation5 + $0x20] sm:$0xff]   ;;  %v415_v14 = vld [vmem:[#allocation5 + $0x18] sm:$0xff]  }
  0x20   :  { %378 = vmatprep.subr.bf16.mxu1 %v471_v0  ;;  %v416_v15 = vld [vmem:[#allocation5 + $0x10] sm:$0xff]   ;;  %v417_v16 = vld [vmem:[#allocation5 + $0x8] sm:$0xff]   ;;  %v418_v17 = vld [vmem:[#allocation5] sm:$0xff]  }
  0x21   :  { %v319_v18 = vld [vmem:[%s526_s2] ss:$0 sm:$0xff] }
  0x22   :  { %359 = vmatpush3.bf16.msra.mxu0 %v403_v2  ;;  %v337_v36 = vld [vmem:[%s528_s4] ss:$0 sm:$0xff] }
  0x23   :  { %360 = vmatprep.subr.bf16.mxu0 %v471_v0  ;;  %379 = vmatpush3.bf16.msra.mxu1 %v412_v11 }
  0x24   :  { %380 = vmatprep.subr.bf16.mxu1 %v471_v0 }
  0x26   :  { %361 = vmatpush3.bf16.msra.mxu0 %v404_v3 }
  0x27   :  { %362 = vmatprep.subr.bf16.mxu0 %v471_v0  ;;  %381 = vmatpush3.bf16.msra.mxu1 %v413_v12 }
  0x28   :  { %382 = vmatprep.subr.bf16.mxu1 %v471_v0 }
  0x2a   :  { %363 = vmatpush3.bf16.msra.mxu0 %v405_v4 }
  0x2b   :  { %364 = vmatprep.subr.bf16.mxu0 %v471_v0  ;;  %383 = vmatpush3.bf16.msra.mxu1 %v414_v13 }
  0x2c   :  { %384 = vmatprep.subr.bf16.mxu1 %v471_v0 }
  0x2e   :  { %365 = vmatpush3.bf16.msra.mxu0 %v406_v5 }
  0x2f   :  { %366 = vmatprep.subr.bf16.mxu0 %v471_v0  ;;  %385 = vmatpush3.bf16.msra.mxu1 %v415_v14 }
  0x30   :  { %386 = vmatprep.subr.bf16.mxu1 %v471_v0 }
  0x32   :  { %367 = vmatpush3.bf16.msra.mxu0 %v407_v6 }
  0x33   :  { %368 = vmatprep.subr.bf16.mxu0 %v471_v0  ;;  %387 = vmatpush3.bf16.msra.mxu1 %v416_v15 }
  0x34   :  { %388 = vmatprep.subr.bf16.mxu1 %v471_v0 }
  0x36   :  { %369 = vmatpush3.bf16.msra.mxu0 %v408_v7 }
  0x37   :  { %370 = vmatprep.subr.bf16.mxu0 %v471_v0  ;;  %389 = vmatpush3.bf16.msra.mxu1 %v417_v16 }
  0x38   :  { %390 = vmatprep.subr.bf16.mxu1 %v471_v0 }
  0x3a   :  { %371 = vmatpush3.bf16.msra.mxu0 %v409_v8 }
  0x3b   :  { %391 = vmatpush3.bf16.msra.mxu1 %v418_v17 }
  0x3d   :  { %373 = vmatmul.mubr.bf16.vlgmr.msra.gmra.mxu0 %v410_v9 }
  0xfd   :  { %v168_v19 = vpop.f32.mrf.mxu0 }
  0xfe   :  { %v169_v20 = vadd.f32 %v319_v18, %v168_v19 }
  0xff   :  { %v374_v21 = vpop.f32.mrf.mxu0 }
 0x100   :  { %v175_v22 = vmul.f32 0.5, %v169_v20 }
 0x101   :  { %v171_v23 = vpop.f32.mrf.mxu0 }
 0x102   :  { %419 = vtanh.f32 %v175_v22  ;;  %v172_v24 = vadd.f32 %v319_v18, %v171_v23 }
 0x103   :  { %v375_v25 = vpop.f32.mrf.mxu0 }
 0x104   :  { %v176_v26 = vmul.f32 0.5, %v172_v24 }
 0x106   :  { %421 = vtanh.f32 %v176_v26 }
 0x10f   :  { %v420_v27 = vpop.eup %419 }
 0x110   :  { %v179_v28 = vmul.f32 0.5, %v420_v27 }
 0x112   :  { %v181_v30 = vadd.f32 0.5, %v179_v28 }
 0x113   :  { %v422_v29 = vpop.eup %421 }
 0x114   :  { %v180_v31 = vmul.f32 0.5, %v422_v29  ;;  %v183_v33 = vmul.f32 %v181_v30, %v169_v20 }
 0x116   :  { %v182_v32 = vadd.f32 0.5, %v180_v31 }
 0x118   :  { %v184_v34 = vmul.f32 %v182_v32, %v172_v24 }
 0x11a   :  { %v187_v35 = vpack.c.bf16 %v184_v34, %v183_v33 }
 0x11c   :  { %393 = vmatmul.mubr.bf16.vlgmr.msra.gmra.mxu1 %v187_v35 }
 0x1dc   :  { %v286_v37 = vpop.f32.mrf.mxu1 }
 0x1dd   :  { %v309_v38 = vadd.f32 %v337_v36, %v286_v37 }
 0x1de   :  { %v394_v39 = vpop.f32.mrf.mxu1 }
 0x1df   :  { %311 = vst [vmem:[%s529_s5] sm:$0xff] %v309_v38 }
 0x1e0   :  { %v289_v40 = vpop.f32.mrf.mxu1 }
 0x1e1   :  { %v310_v41 = vadd.f32 %v337_v36, %v289_v40 }
 0x1e2   :  { %v395_v42 = vpop.f32.mrf.mxu1 }
 0x1e3   :  { %312 = vst [vmem:[%s529_s5 + $0x8] sm:$0xff] %v310_v41 }
 0x1e4   :  { %317 = vsyncpa [#allocation4], 1 }
 0x1e5   :  { %318 = vsyncpa [#allocation6], 1 }

</bundles_post_ra>
